<compile_context>
chip_gen: v7x
topology: tpu7x:2x2x1
jax: 0.10.0
libtpu: 0.0.40
codegen_flags: <defaults>
</compile_context>

<pallas_src>
import functools

import jax
import jax.numpy as jnp
from jax import lax
from jax.experimental import pallas as pl
from jax.experimental.pallas import tpu as pltpu


@functools.lru_cache(maxsize=None)
def _complex_bitcast_supported() -> bool:
    """Probe whether XLA supports a zero-copy complex64 -> float32 bitcast."""
    try:
        probe = jnp.array([[1.0 + 2.0j]], dtype=jnp.complex64)
        got = jax.block_until_ready(lax.bitcast_convert_type(probe, jnp.float32))
        return got.shape == (1, 1, 2) and bool(
            jnp.all(got == jnp.asarray([1.0, 2.0], dtype=jnp.float32)))
    except Exception:  # pylint: disable=broad-except
        return False


def _pool_kernel(x_ref, o_ref, *, k):
    # x_ref: (CT, k*HoT, 2*W)   lane axis = (real, imag)-interleaved width
    # o_ref: (CT,   HoT, 2*(W - k + 1))
    hot = o_ref.shape[1]
    wv = o_ref.shape[2]
    # Height taps: sublane-strided VMEM reads (native strided vld), VPU max.
    r = x_ref[:, pl.ds(0, hot, stride=k), :]
    for a in range(1, k):
        r = jnp.maximum(r, x_ref[:, pl.ds(a, hot, stride=k), :])
    # Width taps: the (re, im) pair of window column b sits 2*b lanes to the
    # right, so a static offset lane slice aligns it; running max over k taps.
    acc = r[:, :, 0:wv]
    for b in range(1, k):
        acc = jnp.maximum(acc, r[:, :, 2 * b:2 * b + wv])
    o_ref[...] = acc


def _largest_divisor(n, limit, quantum=1):
    """Largest divisor of n that is <= limit and a multiple of `quantum`.
    Falls back to n (full extent, always legal for a BlockSpec) if none."""
    limit = max(1, min(n, limit))
    for d in range(limit, 0, -1):
        if n % d == 0 and d % quantum == 0:
            return d
    return n


@functools.partial(jax.jit, static_argnames=("kernel_size", "use_bitcast"))
def _complex_max_pool2d(x, *, kernel_size, use_bitcast):
    k = kernel_size
    n, c, h, w = x.shape
    ho, wo = h // k, w // k
    if ho == 0 or wo == 0:
        raise ValueError(f"Input spatial dims {h}x{w} smaller than kernel {k}")
    del wo
    hc = ho * k                      # floor-mode crop along H
    nc = n * c
    wv = 2 * (w - k + 1)             # running-max width on interleaved lanes

    if x.dtype != jnp.complex64:
        x = x.astype(jnp.complex64)
    xc = x[:, :, :hc, :]

    # complex64 -> interleaved float32 (..., W, 2): zero-copy bitcast when
    # supported, otherwise one fused stack pass (no separate concat pass).
    if use_bitcast:
        pf = lax.bitcast_convert_type(xc, jnp.float32)            # (N,C,Hc,W,2)
    else:
        pf = jnp.stack([jnp.real(xc), jnp.imag(xc)], axis=-1)     # (N,C,Hc,W,2)
    parts = pf.reshape(nc, hc, 2 * w)                             # free reshape

    # Tile sizes: input blocks ~<= 2 MiB; second-to-last block dims are
    # multiples of 8 (or the full extent) to satisfy the (8, 128) tiling rule.
    lane_bytes = 2 * w * 4
    hot = _largest_divisor(ho, (512 * 1024) // max(1, k * lane_bytes), quantum=8)
    ct = _largest_divisor(nc, (2 * 1024 * 1024) // max(1, k * hot * lane_bytes))

    grid = (nc // ct, ho // hot)
    pooled = pl.pallas_call(
        functools.partial(_pool_kernel, k=k),
        out_shape=jax.ShapeDtypeStruct((nc, ho, wv), jnp.float32),
        grid=grid,
        in_specs=[pl.BlockSpec((ct, k * hot, 2 * w), lambda i, j: (i, j, 0))],
        out_specs=pl.BlockSpec((ct, hot, wv), lambda i, j: (i, j, 0)),
        compiler_params=pltpu.CompilerParams(
            dimension_semantics=("parallel", "parallel"),
            vmem_limit_bytes=32 * 1024 * 1024),
    )(parts)

    # Epilogue (single fused XLA op): take every k-th pooled column pair and
    # reassemble complex64.  No transposes anywhere.
    pooled = pooled.reshape(n, c, ho, wv)
    real = pooled[..., 0::2 * k]
    imag = pooled[..., 1::2 * k]
    return lax.complex(real, imag)


class ComplexMaxPool2d:
    """Pallas-TPU forward pass of the PyTorch ComplexMaxPool2d module."""

    def __init__(self, kernel_size, stride=None, padding=0, dilation=1,
                 return_indices=False, ceil_mode=False):
        if isinstance(kernel_size, (tuple, list)):
            if len(set(kernel_size)) != 1:
                raise NotImplementedError("Only square kernels are supported")
            kernel_size = int(kernel_size[0])
        self.kernel_size = int(kernel_size)
        if stride is None:
            stride = self.kernel_size
        if isinstance(stride, (tuple, list)):
            if len(set(stride)) != 1:
                raise NotImplementedError("Only square strides are supported")
            stride = int(stride[0])
        self.stride = stride
        self.padding = padding
        self.dilation = dilation
        self.return_indices = return_indices
        self.ceil_mode = ceil_mode
        # TODO(synk): padding>0, dilation>1, stride != kernel_size, ceil_mode and
        # return_indices are not implemented in this Pallas version.
        if (self.padding != 0 or self.dilation != 1 or self.ceil_mode
                or self.return_indices or self.stride != self.kernel_size):
            raise NotImplementedError(
                "Pallas ComplexMaxPool2d supports stride==kernel_size, padding=0, "
                "dilation=1, ceil_mode=False, return_indices=False")

    def __call__(self, x):
        if not jnp.iscomplexobj(x):
            raise ValueError(f"Input should be a complex tensor, Got {x.dtype}")
        return _complex_max_pool2d(
            x, kernel_size=self.kernel_size,
            use_bitcast=_complex_bitcast_supported())


def _reference(x, k, s):
    def pool(p):
        return lax.reduce_window(p, -jnp.inf, lax.max,
                                 (1, 1, k, k), (1, 1, s, s), "VALID")
    return (pool(jnp.real(x)) + 1j * pool(jnp.imag(x))).astype(jnp.complex64)


if __name__ == "__main__":
    key = jax.random.PRNGKey(0)
    kr, ki = jax.random.split(key)
    N, C, H, W = 2, 4, 16, 16
    x = (jax.random.normal(kr, (N, C, H, W), dtype=jnp.float32)
         + 1j * jax.random.normal(ki, (N, C, H, W), dtype=jnp.float32)
         ).astype(jnp.complex64)

    pool = ComplexMaxPool2d(kernel_size=2)
    out = jax.block_until_ready(pool(x))

    ref = _reference(x, 2, 2)
    assert out.shape == (N, C, H // 2, W // 2), out.shape
    assert out.dtype == jnp.complex64, out.dtype
    assert jnp.allclose(out, ref), "mismatch vs reduce_window reference"

    print("KERNEL_OK")
</pallas_src>

<mosaic_0001>
module attributes {stable_mosaic.version = 11 : i64} {
  func.func @_pool_kernel(%arg0: i32, %arg1: i32, %arg2: memref<8x16x32xf32, #tpu.memory_space<vmem>>, %arg3: memref<8x8x30xf32, #tpu.memory_space<vmem>>) attributes {dimension_semantics = [#tpu.dimension_semantics<parallel>, #tpu.dimension_semantics<parallel>], iteration_bounds = array<i64: 1, 1>, scalar_prefetch = 0 : i64, scratch_operands = 0 : i64, tpu.core_type = #tpu.core_type<tc>, window_params = [{transform_indices = @transform_0, window_bounds = array<i64: 8, 16, 32>}, {transform_indices = @transform_1, window_bounds = array<i64: 8, 8, 30>}]} {
    %c0 = arith.constant 0 : index
    %c0_0 = arith.constant 0 : index
    %c0_1 = arith.constant 0 : index
    %0 = tpu.strided_load %arg2[%c0, %c0_0, %c0_1] {strides = array<i32: 1, 2, 1>} : memref<8x16x32xf32, #tpu.memory_space<vmem>>, vector<8x8x32xf32>
    %c0_2 = arith.constant 0 : index
    %c1 = arith.constant 1 : index
    %c0_3 = arith.constant 0 : index
    %1 = tpu.strided_load %arg2[%c0_2, %c1, %c0_3] {strides = array<i32: 1, 2, 1>} : memref<8x16x32xf32, #tpu.memory_space<vmem>>, vector<8x8x32xf32>
    %2 = arith.maximumf %0, %1 : vector<8x8x32xf32>
    %3 = vector.extract_strided_slice %2 {offsets = [0, 0, 0], sizes = [8, 8, 30], strides = [1, 1, 1]} : vector<8x8x32xf32> to vector<8x8x30xf32>
    %4 = vector.extract_strided_slice %2 {offsets = [0, 0, 2], sizes = [8, 8, 30], strides = [1, 1, 1]} : vector<8x8x32xf32> to vector<8x8x30xf32>
    %5 = arith.maximumf %3, %4 : vector<8x8x30xf32>
    %c0_4 = arith.constant 0 : index
    %c0_5 = arith.constant 0 : index
    %c0_6 = arith.constant 0 : index
    %6 = vector.load %arg3[%c0_4, %c0_5, %c0_6] : memref<8x8x30xf32, #tpu.memory_space<vmem>>, vector<8x8x30xf32>
    tpu.vector_store %arg3[%c0_4, %c0_5, %c0_6], %5 {strides = array<i32>} : memref<8x8x30xf32, #tpu.memory_space<vmem>>, vector<8x8x30xf32>,
    return
  }
  func.func @transform_0(%arg0: i32, %arg1: i32) -> (i32, i32, i32) {
    %c0_i32 = arith.constant 0 : i32
    %c0_i32_0 = arith.constant 0 : i32
    return %arg0, %arg1, %c0_i32 : i32, i32, i32
  }
  func.func @transform_1(%arg0: i32, %arg1: i32) -> (i32, i32, i32) {
    %c0_i32 = arith.constant 0 : i32
    %c0_i32_0 = arith.constant 0 : i32
    return %arg0, %arg1, %c0_i32 : i32, i32, i32
  }
}

</mosaic_0001>

<bundles_post_ra>
// kernel: custom-call
= control target key start
LH: loop header
LB: loop body
LE: loop exit
PB: predicated region body
PF: predicated region fallthrough
CT: control target
= control target key end

     0   :  { %2 = vsyncpa [#allocation0], 0  ;;  %s61_s0 = inlined_call_operand.hbm [shape: c64[2,4,16,16], index: 0, kind: input, shape index: {}]   ;;  %s62_s1 = inlined_call_operand.vmem [shape: f32[2,4,16,16], index: 1, kind: output, shape index: {}]  }
   0x1   :  { %s3_s8 = sshll.u32 %s62_s1, 4  ;;  %s9_s11 = scalar_lea.hbm %s61_s0, 2048  ;;  %s4_s8 = int_to_ptr.vmem [resolvable:$true] %s3_s8 }
   0x2   :  { %p10_p0 = scmp.ne.s32.totalorder %s61_s0, %s9_s11  ;;  %s11_s16 = scalar_lea.hbm %s61_s0, 4096 }
   0x3   :  { %p12_p1 = scmp.lt.u32.totalorder %s11_s16, %s9_s11  ;;  %p13_p2 = scmp.lt.u32.totalorder %s9_s11, %s61_s0 }
   0x5   :  { %p14_p3 = por %p13_p2, %p12_p1 }
   0x7   :  { %p15_p4 = pnand %p14_p3, %p10_p0 }
   0x9   :  { %18 = shalt.err (!%p15_p4)  }
   0xa   :  { %s19_s1 = scalar_lea.vmem %s4_s8, 2048  ;;  %p24_p6 = scmp.lt.s32.totalorder %s4_s8, %s4_s8 }
   0xb   :  { %p20_p5 = scmp.ne.s32.totalorder %s4_s8, %s19_s1  ;;  %p25_p7 = scmp.lt.s32.totalorder %s19_s1, %s19_s1 }
   0xd   :  { %p26_p8 = por %p25_p7, %p24_p6 }
   0xf   :  { %p27_p9 = pnand %p26_p8, %p20_p5 }
  0x11   :  { %30 = shalt.err (!%p27_p9)  }
  0x12   :  { %6 = dma.hbm_to_vmem [thread:$0]  %s61_s0, 2048, %s4_s8, [#allocation0] }
  0x13   :  { %31 = dma.done.wait [#allocation0], 2048  }
  0x14   :  { %32 = vsyncadd [#allocation0], 4294965248 }
  0x15   :  { %8 = vsyncpa [#allocation0], 1 }

// kernel: custom-call.1
= control target key start
LH: loop header
LB: loop body
LE: loop exit
PB: predicated region body
PF: predicated region fallthrough
CT: control target
= control target key end

     0   :  { %s59_s0 = inlined_call_operand.hbm [shape: c64[2,4,16,16], index: 0, kind: input, shape index: {}]   ;;  %s60_s1 = inlined_call_operand.vmem [shape: f32[2,4,16,16], index: 1, kind: output, shape index: {}]  }
   0x1   :  { %s2_s8 = scalar_lea.hbm %s59_s0, 2048 }
   0x2   :  { %3 = vsyncpa [#allocation0], 0  ;;  %s4_s11 = sshll.u32 %s60_s1, 4  ;;  %s34_s14 = scalar_lea.hbm %s59_s0, 4096  ;;  %s5_s11 = int_to_ptr.vmem [resolvable:$true] %s4_s11 }
   0x3   :  { %p11_p0 = scmp.ne.s32.totalorder %s2_s8, %s34_s14  ;;  %p13_p1 = scmp.lt.u32.totalorder %s2_s8, %s59_s0 }
   0x4   :  { %p14_p2 = scmp.lt.u32.totalorder %s34_s14, %s34_s14  ;;  %p16_p4 = scmp.lt.u32.totalorder %s34_s14, %s2_s8 }
   0x6   :  { %p15_p3 = por %p14_p2, %p13_p1 }
   0x8   :  { %p17_p5 = por %p16_p4, %p15_p3 }
   0xa   :  { %p18_p6 = pnand %p17_p5, %p11_p0 }
   0xc   :  { %21 = shalt.err (!%p18_p6)  }
   0xd   :  { %s22_s17 = scalar_lea.vmem %s5_s11, 2048  ;;  %p27_p8 = scmp.lt.s32.totalorder %s5_s11, %s5_s11 }
   0xe   :  { %p23_p7 = scmp.ne.s32.totalorder %s5_s11, %s22_s17  ;;  %p28_p9 = scmp.lt.s32.totalorder %s22_s17, %s22_s17 }
  0x10   :  { %p29_p10 = por %p28_p9, %p27_p8 }
  0x12   :  { %p30_p11 = pnand %p29_p10, %p23_p7 }
  0x14   :  { %33 = shalt.err (!%p30_p11)  }
  0x15   :  { %7 = dma.hbm_to_vmem [thread:$0]  %s2_s8, 2048, %s5_s11, [#allocation0] }
  0x16   :  { %35 = dma.done.wait [#allocation0], 2048  }
  0x17   :  { %36 = vsyncadd [#allocation0], 4294965248 }
  0x18   :  { %9 = vsyncpa [#allocation0], 1 }

// kernel: custom-call.2
= control target key start
LH: loop header
LB: loop body
LE: loop exit
PB: predicated region body
PF: predicated region fallthrough
CT: control target
= control target key end

     0   :  { %s126_s0 = inlined_call_operand.vmem [shape: f32[2,4,8,8], index: 0, kind: input, shape index: {}]   ;;  %s127_s1 = inlined_call_operand.vmem [shape: f32[2,4,8,8], index: 1, kind: input, shape index: {}]   ;;  %s128_s2 = inlined_call_operand.hbm [shape: c64[2,4,8,8], index: 2, kind: output, shape index: {}]  }
   0x1   :  { %s87_s11 = scalar_lea.hbm %s128_s2, 1024 }
   0x2   :  { %4 = vsyncpa [#allocation0], 0  ;;  %s5_s14 = sshll.u32 %s126_s0, 4  ;;  %s6_s14 = int_to_ptr.vmem [resolvable:$true] %s5_s14 }
   0x3   :  { %s18_s15 = scalar_lea.vmem %s6_s14, 1024  ;;  %p23_p1 = scmp.lt.s32.totalorder %s6_s14, %s6_s14 }
   0x4   :  { %p19_p0 = scmp.ne.s32.totalorder %s6_s14, %s18_s15  ;;  %p24_p2 = scmp.lt.s32.totalorder %s18_s15, %s18_s15 }
   0x6   :  { %p25_p3 = por %p24_p2, %p23_p1 }
   0x8   :  { %p26_p4 = pnand %p25_p3, %p19_p0 }
   0xa   :  { %29 = shalt.err (!%p26_p4)  }
   0xb   :  { %p31_p5 = scmp.ne.s32.totalorder %s128_s2, %s87_s11  ;;  %s32_s0 = scalar_lea.hbm %s128_s2, 2048 }
   0xc   :  { %p33_p6 = scmp.lt.u32.totalorder %s32_s0, %s87_s11  ;;  %p34_p7 = scmp.lt.u32.totalorder %s87_s11, %s128_s2 }
   0xe   :  { %p35_p8 = por %p34_p7, %p33_p6 }
  0x10   :  { %p36_p9 = pnand %p35_p8, %p31_p5 }
  0x12   :  { %39 = shalt.err (!%p36_p9)  }
  0x13   :  { %8 = dma.vmem_to_hbm [thread:$0]  %s6_s14, 1024, %s128_s2, [#allocation0] }
  0x14   :  { %65 = dma.done.wait [#allocation0], 1024  }
  0x15   :  { %66 = vsyncadd [#allocation0], 4294966272 }
  0x16   :  { %10 = vsyncpa [#allocation0], 1 }
  0x17   :  { %11 = vsyncpa [#allocation1], 0  ;;  %s12_s28 = sshll.u32 %s127_s1, 4  ;;  %s13_s28 = int_to_ptr.vmem [resolvable:$true] %s12_s28 }
  0x18   :  { %s40_s29 = scalar_lea.vmem %s13_s28, 1024  ;;  %p45_p11 = scmp.lt.s32.totalorder %s13_s28, %s13_s28 }
  0x19   :  { %p41_p10 = scmp.ne.s32.totalorder %s13_s28, %s40_s29  ;;  %p46_p12 = scmp.lt.s32.totalorder %s40_s29, %s40_s29 }
  0x1b   :  { %p47_p13 = por %p46_p12, %p45_p11 }
  0x1d   :  { %p48_p0 = pnand %p47_p13, %p41_p10 }
  0x1f   :  { %51 = shalt.err (!%p48_p0)  }
  0x20   :  { %p53_p1 = scmp.ne.s32.totalorder %s87_s11, %s32_s0  ;;  %p56_p2 = scmp.lt.u32.totalorder %s32_s0, %s32_s0 }
  0x22   :  { %p57_p3 = por %p56_p2, %p34_p7 }
  0x24   :  { %p59_p4 = por %p57_p3, %p33_p6 }
  0x26   :  { %p60_p5 = pnand %p59_p4, %p53_p1 }
  0x28   :  { %63 = shalt.err (!%p60_p5)  }
  0x29   :  { %15 = dma.vmem_to_hbm [thread:$0]  %s13_s28, 1024, %s87_s11, [#allocation1] }
  0x2a   :  { %67 = dma.done.wait [#allocation1], 1024  }
  0x2b   :  { %68 = vsyncadd [#allocation1], 4294966272 }
  0x2c   :  { %17 = vsyncpa [#allocation1], 1 }

// kernel: _complex_max_pool2d.1
= control target key start
LH: loop header
LB: loop body
LE: loop exit
PB: predicated region body
PF: predicated region fallthrough
CT: control target
= control target key end

     0   :  { %s116_s22 = smov 126   ;;  %vm87_vm0 = vcmask 244736   ;;  %s207_s0 = inlined_call_operand.vmem [shape: f32[8,16,32], index: 0, kind: input, shape index: {}]   ;;  %s208_s1 = inlined_call_operand.vmem [shape: f32[8,8,30], index: 1, kind: output, shape index: {}]  }
   0x1   :  { %v101_v0 = vld [vmem:[%s207_s0 + $0x20] ss:$2 sm:$0xff]  ;;  %v109_v1 = vld [vmem:[%s207_s0 + $0x21] ss:$2 sm:$0xff]  ;;  %v102_v5 = vld [vmem:[%s207_s0 + $0x30] ss:$2 sm:$0xff] }
   0x2   :  { %v8_v2 = vld [vmem:[%s207_s0] ss:$2 sm:$0xff]  ;;  %v41_v3 = vmax.f32 %v101_v0, %v109_v1  ;;  %v107_v4 = vld [vmem:[%s207_s0 + $0x1] ss:$2 sm:$0xff]  ;;  %v110_v6 = vld [vmem:[%s207_s0 + $0x31] ss:$2 sm:$0xff] }
   0x3   :  { %v39_v7 = vmax.f32 %v8_v2, %v107_v4  ;;  %v100_v8 = vld [vmem:[%s207_s0 + $0x10] ss:$2 sm:$0xff]  ;;  %v108_v9 = vld [vmem:[%s207_s0 + $0x11] ss:$2 sm:$0xff]  ;;  %v42_v10 = vmax.f32 %v102_v5, %v110_v6  ;;  %v103_v14 = vld [vmem:[%s207_s0 + $0x40] ss:$2 sm:$0xff] }
   0x4   :  { %59 = vrot.lane.b32.xlu1 %v41_v3, %s116_s22  ;;  %v40_v11 = vmax.f32 %v100_v8, %v108_v9  ;;  %v104_v12 = vld [vmem:[%s207_s0 + $0x50] ss:$2 sm:$0xff]  ;;  %v112_v13 = vld [vmem:[%s207_s0 + $0x51] ss:$2 sm:$0xff]  ;;  %v111_v15 = vld [vmem:[%s207_s0 + $0x41] ss:$2 sm:$0xff] }
   0x5   :  { %55 = vrot.lane.b32.xlu0 %v39_v7, %s116_s22  ;;  %v44_v16 = vmax.f32 %v104_v12, %v112_v13  ;;  %v43_v17 = vmax.f32 %v103_v14, %v111_v15  ;;  %v106_v18 = vld [vmem:[%s207_s0 + $0x70] ss:$2 sm:$0xff]  ;;  %v114_v19 = vld [vmem:[%s207_s0 + $0x71] ss:$2 sm:$0xff]  ;;  %v105_v20 = vld [vmem:[%s207_s0 + $0x60] ss:$2 sm:$0xff] }
   0x6   :  { %v113_v21 = vld [vmem:[%s207_s0 + $0x61] ss:$2 sm:$0xff]  ;;  %v46_v22 = vmax.f32 %v106_v18, %v114_v19 }
   0x7   :  { %v45_v23 = vmax.f32 %v105_v20, %v113_v21 }
   0x8   :  { %61 = vrot.lane.b32.xlu1 %v42_v10, %s116_s22 }
   0x9   :  { %57 = vrot.lane.b32.xlu0 %v40_v11, %s116_s22 }
   0xc   :  { %65 = vrot.lane.b32.xlu1 %v44_v16, %s116_s22 }
   0xd   :  { %63 = vrot.lane.b32.xlu0 %v43_v17, %s116_s22 }
  0x10   :  { %69 = vrot.lane.b32.xlu1 %v46_v22, %s116_s22 }
  0x11   :  { %67 = vrot.lane.b32.xlu0 %v45_v23, %s116_s22 }
  0x76   :  { %v60_v24 = vpop.permute.xlu1 %59 }
  0x77   :  { %v81_v25 = vmax.f32 %v41_v3, %v60_v24  ;;  %v56_v26 = vpop.permute.xlu0 %55 }
  0x78   :  { %v79_v27 = vmax.f32 %v39_v7, %v56_v26 }
  0x79   :  { %90 = vst.msk [vmem:[%s208_s1 + $0x10] sm:$0xff] %vm87_vm0, %v81_v25 }
  0x7a   :  { %88 = vst.msk [vmem:[%s208_s1] sm:$0xff] %vm87_vm0, %v79_v27  ;;  %v62_v28 = vpop.permute.xlu1 %61 }
  0x7b   :  { %v82_v29 = vmax.f32 %v42_v10, %v62_v28  ;;  %v58_v30 = vpop.permute.xlu0 %57 }
  0x7c   :  { %v80_v31 = vmax.f32 %v40_v11, %v58_v30 }
  0x7d   :  { %91 = vst.msk [vmem:[%s208_s1 + $0x18] sm:$0xff] %vm87_vm0, %v82_v29 }
  0x7e   :  { %89 = vst.msk [vmem:[%s208_s1 + $0x8] sm:$0xff] %vm87_vm0, %v80_v31  ;;  %v66_v32 = vpop.permute.xlu1 %65 }
  0x7f   :  { %v84_v33 = vmax.f32 %v44_v16, %v66_v32  ;;  %v64_v34 = vpop.permute.xlu0 %63 }
  0x80   :  { %v83_v35 = vmax.f32 %v43_v17, %v64_v34 }
  0x81   :  { %93 = vst.msk [vmem:[%s208_s1 + $0x28] sm:$0xff] %vm87_vm0, %v84_v33 }
  0x82   :  { %92 = vst.msk [vmem:[%s208_s1 + $0x20] sm:$0xff] %vm87_vm0, %v83_v35  ;;  %v70_v36 = vpop.permute.xlu1 %69 }
  0x83   :  { %v86_v37 = vmax.f32 %v46_v22, %v70_v36  ;;  %v68_v38 = vpop.permute.xlu0 %67 }
  0x84   :  { %v85_v39 = vmax.f32 %v45_v23, %v68_v38 }
  0x85   :  { %95 = vst.msk [vmem:[%s208_s1 + $0x38] sm:$0xff] %vm87_vm0, %v86_v37 }
  0x86   :  { %94 = vst.msk [vmem:[%s208_s1 + $0x30] sm:$0xff] %vm87_vm0, %v85_v39 }

</bundles_post_ra>
